<compile_context>
chip_gen: v7x
topology: tpu7x:2x2x1
jax: 0.10.0
libtpu: 0.0.40
codegen_flags: <defaults>
</compile_context>

<pallas_src>
import functools
import math

import jax
import jax.numpy as jnp
from jax import lax
from jax.experimental import pallas as pl
from jax.experimental.pallas import tpu as pltpu

LANE = 128
SUBLANE = 8
_TARGET_BLOCK_BYTES = 8 * 1024 * 1024   # per streamed input buffer (double-buffered)
_MAX_BLOCK_C = 4096                     # column tile for the multi-block path
_VMEM_LIMIT_BYTES = 40 << 20            # < 64 MiB physical (v7x), < 128 MiB (v5e/v6e)


def _round_up(x, m):
    return (x + m - 1) // m * m


def _round_down(x, m):
    return x // m * m


def _lanewise_sum(x, width):
    """Row sums of x (rows, width), keepdims=True.

    Lane-wise VPU adds over 128-wide static slices followed by a single
    cross-lane (XLU) reduce, instead of one big cross-lane reduce.
    """
    if width % LANE == 0 and width >= 2 * LANE:
        acc = x[:, 0:LANE]
        for t in range(1, width // LANE):
            acc = acc + x[:, t * LANE:(t + 1) * LANE]
        return jnp.sum(acc, axis=-1, keepdims=True)
    return jnp.sum(x, axis=-1, keepdims=True)


def _avg2d_single_kernel(x_ref, o_ref, *, inv_count, block_c):
    """All columns fit in one block: no reduction grid axis, no scratch."""
    x = x_ref[...].astype(jnp.float32)
    o_ref[...] = (_lanewise_sum(x, block_c) * inv_count).astype(o_ref.dtype)


def _avg2d_reduce_kernel(x_ref, o_ref, acc_ref, *, inv_count, cols, block_c):
    """Columns tiled along grid axis 1; lane-wise f32 accumulator in VMEM."""
    j = pl.program_id(1)

    @pl.when(j == 0)
    def _init():
        acc_ref[...] = jnp.zeros_like(acc_ref)

    x = x_ref[...].astype(jnp.float32)
    if cols % block_c != 0:
        # The last column block reaches past the array; out-of-bounds lanes
        # hold unspecified data, so mask them before accumulating.
        col = j * block_c + lax.broadcasted_iota(jnp.int32, (1, block_c), 1)
        x = jnp.where(col < cols, x, 0.0)

    # Lane-wise partial sums: pure VPU work every grid step.
    partial = x[:, 0:LANE]
    for t in range(1, block_c // LANE):
        partial = partial + x[:, t * LANE:(t + 1) * LANE]
    acc_ref[...] += partial

    @pl.when(j == pl.num_programs(1) - 1)
    def _finalize():
        s = jnp.sum(acc_ref[...], axis=-1, keepdims=True)  # one XLU reduce per row block
        o_ref[...] = (s * inv_count).astype(o_ref.dtype)


def avg2d(x):
    """Global spatial mean: (N, C, *spatial) -> (N, C). Matches torch Avg2d."""
    n, c = int(x.shape[0]), int(x.shape[1])
    cols = int(math.prod(x.shape[2:]))
    rows = n * c
    x2 = x.reshape(rows, cols)            # free view of a contiguous NCHW tensor

    itemsize = jnp.dtype(x.dtype).itemsize
    rows8 = _round_up(rows, SUBLANE)

    # ---- column blocking ----------------------------------------------------
    if cols <= _MAX_BLOCK_C:
        block_c = cols                    # full-dim block: exempt from the 128 rule
        grid_c = 1
    else:
        block_c = _MAX_BLOCK_C
        grid_c = pl.cdiv(cols, block_c)   # remainder masked in-kernel

    # ---- row blocking from a VMEM byte budget -------------------------------
    # Account for lane padding of narrow blocks plus the f32 accumulator /
    # output rows so the double-buffered working set stays inside the limit.
    padded_c = _round_up(block_c, LANE)
    bytes_per_row = padded_c * itemsize + 2 * LANE * 4
    block_r = max(SUBLANE, _round_down(_TARGET_BLOCK_BYTES // bytes_per_row, SUBLANE))
    block_r = min(block_r, rows8)
    # Keep >=2 row blocks when rows allow it so the "parallel" axis can shard
    # across v7x's two TensorCores.
    if block_r >= rows8 and rows8 >= 2 * SUBLANE:
        block_r = _round_up(rows8 // 2, SUBLANE)
    grid_r = pl.cdiv(rows, block_r)

    inv_count = 1.0 / float(cols)
    out_shape = jax.ShapeDtypeStruct((rows, 1), x.dtype)

    if grid_c == 1:
        kernel = functools.partial(_avg2d_single_kernel,
                                   inv_count=inv_count, block_c=block_c)
        out = pl.pallas_call(
            kernel,
            out_shape=out_shape,
            grid_spec=pltpu.PrefetchScalarGridSpec(
                num_scalar_prefetch=0,
                grid=(grid_r,),
                in_specs=[pl.BlockSpec((block_r, block_c), lambda i: (i, 0))],
                out_specs=pl.BlockSpec((block_r, 1), lambda i: (i, 0)),
            ),
            compiler_params=pltpu.CompilerParams(
                dimension_semantics=("parallel",),
                vmem_limit_bytes=_VMEM_LIMIT_BYTES),
        )(x2)
    else:
        kernel = functools.partial(_avg2d_reduce_kernel,
                                   inv_count=inv_count, cols=cols, block_c=block_c)
        out = pl.pallas_call(
            kernel,
            out_shape=out_shape,
            grid_spec=pltpu.PrefetchScalarGridSpec(
                num_scalar_prefetch=0,
                grid=(grid_r, grid_c),
                in_specs=[pl.BlockSpec((block_r, block_c), lambda i, j: (i, j))],
                out_specs=pl.BlockSpec((block_r, 1), lambda i, j: (i, 0)),
                scratch_shapes=[pltpu.VMEM((block_r, LANE), jnp.float32)],
            ),
            compiler_params=pltpu.CompilerParams(
                dimension_semantics=("parallel", "arbitrary"),
                vmem_limit_bytes=_VMEM_LIMIT_BYTES),
        )(x2)

    return out[:, 0].reshape(n, c)


if __name__ == "__main__":
    key = jax.random.PRNGKey(0)

    # Primary example (PyTorch NCHW convention).
    x = jax.random.normal(key, (2, 4, 16, 16), jnp.float32)
    out = jax.block_until_ready(jax.jit(avg2d)(x))
    ref = jnp.mean(x.reshape(2, 4, -1), axis=-1)
    assert out.shape == (2, 4), out.shape
    assert jnp.all(jnp.isfinite(out))
    assert jnp.allclose(out, ref, atol=1e-5, rtol=1e-5)

    # Rows not a multiple of 8 + multiple row blocks (partial-block path).
    x2 = jax.random.normal(jax.random.PRNGKey(1), (3, 5, 48, 48), jnp.float32)
    out2 = jax.block_until_ready(jax.jit(avg2d)(x2))
    ref2 = jnp.mean(x2.reshape(3, 5, -1), axis=-1)
    assert jnp.allclose(out2, ref2, atol=1e-5, rtol=1e-5)

    # Large spatial size: multi-block column reduction with in-kernel masking.
    x3 = jax.random.normal(jax.random.PRNGKey(2), (2, 3, 80, 80), jnp.float32)
    out3 = jax.block_until_ready(jax.jit(avg2d)(x3))
    ref3 = jnp.mean(x3.reshape(2, 3, -1), axis=-1)
    assert jnp.allclose(out3, ref3, atol=1e-5, rtol=1e-5)

    print("KERNEL_OK")
</pallas_src>

<mosaic_0001>
module attributes {stable_mosaic.version = 11 : i64} {
  func.func @_avg2d_single_kernel(%arg0: i32, %arg1: memref<8x256xf32, #tpu.memory_space<vmem>>, %arg2: memref<8x1xf32, #tpu.memory_space<vmem>>) attributes {dimension_semantics = [#tpu.dimension_semantics<parallel>], iteration_bounds = array<i64: 1>, scalar_prefetch = 0 : i64, scratch_operands = 0 : i64, tpu.core_type = #tpu.core_type<tc>, window_params = [{transform_indices = @transform_0, window_bounds = array<i64: 8, 256>}, {transform_indices = @transform_1, window_bounds = array<i64: 8, 1>}]} {
    %c0 = arith.constant 0 : index
    %c0_0 = arith.constant 0 : index
    %0 = vector.load %arg1[%c0, %c0_0] : memref<8x256xf32, #tpu.memory_space<vmem>>, vector<8x256xf32>
    %1 = vector.extract_strided_slice %0 {offsets = [0, 0], sizes = [8, 128], strides = [1, 1]} : vector<8x256xf32> to vector<8x128xf32>
    %2 = vector.extract_strided_slice %0 {offsets = [0, 128], sizes = [8, 128], strides = [1, 1]} : vector<8x256xf32> to vector<8x128xf32>
    %3 = arith.addf %1, %2 : vector<8x128xf32>
    %cst = arith.constant dense<0.000000e+00> : vector<8xf32>
    %4 = vector.multi_reduction <add>, %3, %cst [1] : vector<8x128xf32> to vector<8xf32>
    %5 = vector.shape_cast %4 : vector<8xf32> to vector<8x1xf32>
    %cst_1 = arith.constant 3.906250e-03 : f32
    %6 = vector.broadcast %cst_1 : f32 to vector<8x1xf32>
    %7 = arith.mulf %5, %6 : vector<8x1xf32>
    %c0_2 = arith.constant 0 : index
    %c0_3 = arith.constant 0 : index
    %8 = vector.load %arg2[%c0_2, %c0_3] : memref<8x1xf32, #tpu.memory_space<vmem>>, vector<8x1xf32>
    tpu.vector_store %arg2[%c0_2, %c0_3], %7 {strides = array<i32>} : memref<8x1xf32, #tpu.memory_space<vmem>>, vector<8x1xf32>,
    return
  }
  func.func @transform_0(%arg0: i32) -> (i32, i32) {
    %c0_i32 = arith.constant 0 : i32
    %c0_i32_0 = arith.constant 0 : i32
    return %arg0, %c0_i32 : i32, i32
  }
  func.func @transform_1(%arg0: i32) -> (i32, i32) {
    %c0_i32 = arith.constant 0 : i32
    %c0_i32_0 = arith.constant 0 : i32
    return %arg0, %c0_i32 : i32, i32
  }
}

</mosaic_0001>

<bundles_post_ra>
// kernel: squeeze.1
= control target key start
LH: loop header
LB: loop body
LE: loop exit
PB: predicated region body
PF: predicated region fallthrough
CT: control target
= control target key end

     0   :  { %s85_s0 = inlined_call_operand.vmem [shape: f32[8], index: 0, kind: input, shape index: {}]   ;;  %s86_s1 = inlined_call_operand.hbm [shape: f32[2,4], index: 1, kind: output, shape index: {}]  }
   0x1   :  { %v5_v0 = vld [vmem:[%s85_s0] sm:$0x1] }
   0x2   :  { %2 = vsyncpa [#allocation1], 0  ;;  %6 = vst [vmem:[#allocation3] sm:$0x1] %v5_v0  ;;  %vm8_vm0 = vcmask 31744   ;;  %s58_s0 = smov 124  }
   0x3   :  { %s59_s8 = smov [#allocation0]  }
   0x4   :  { %s26_s9 = sshll.u32 %s59_s8, 4  ;;  %s27_s9 = int_to_ptr.vmem [resolvable:$true] %s26_s9 }
   0x5   :  { %s34_s10 = scalar_lea.vmem %s27_s9, 32  ;;  %p39_p1 = scmp.lt.s32.totalorder %s27_s9, %s27_s9 }
   0x6   :  { %p35_p0 = scmp.ne.s32.totalorder %s27_s9, %s34_s10  ;;  %p40_p2 = scmp.lt.s32.totalorder %s34_s10, %s34_s10 }
   0x8   :  { %p41_p3 = por %p40_p2, %p39_p1 }
   0x9   :  { %v10_v1 = vld [vmem:[#allocation3] sm:$0x1]  }
   0xa   :  { %v7_v2 = vld [vmem:[#allocation3] sm:$0x1]   ;;  %11 = vrot.lane.b32.xlu0 %v10_v1, %s58_s0  ;;  %p42_p4 = pnand %p41_p3, %p35_p0 }
   0xb   :  { %9 = vst.msk [vmem:[#allocation2] sm:$0x1] %vm8_vm0, %v7_v2  }
  0x7c   :  { %v12_v3 = vpop.permute.xlu0 %11  }
  0x7d   :  { %15 = vst.msk [vmem:[#allocation2 + $0x1] sm:$0x1] %vm8_vm0, %v12_v3  }
  0x84   :  { %v19_v4 = vld [vmem:[#allocation2] sm:$0x3] }
  0x85   :  { %21 = vst [vmem:[#allocation0] sm:$0x3] %v19_v4 }
  0x86   :  { %45 = shalt.err (!%p42_p4)
}
  0x87   :  { %s46_s13 = scalar_lea.hbm %s86_s1, 32 }
  0x88   :  { %p47_p5 = scmp.ne.s32.totalorder %s86_s1, %s46_s13  ;;  %p50_p6 = scmp.lt.u32.totalorder %s46_s13, %s86_s1 }
  0x8a   :  { %p52_p7 = pnand %p50_p6, %p47_p5 }
  0x8c   :  { %55 = shalt.err (!%p52_p7)
}
  0x8d   :  { %29 = dma.vmem_to_hbm [thread:$0]  %s27_s9, 32, %s86_s1, [#allocation1]  }
  0x8e   :  { %56 = dma.done.wait [#allocation1], 32  }
  0x8f   :  { %57 = vsyncadd [#allocation1], 4294967264 }
  0x90   :  { %31 = vsyncpa [#allocation1], 1 }

// kernel: avg2d.1
= control target key start
LH: loop header
LB: loop body
LE: loop exit
PB: predicated region body
PF: predicated region fallthrough
CT: control target
= control target key end

     0   :  { %vm14_vm0 = vcmask 7168   ;;  %s39_s0 = inlined_call_operand.vmem [shape: f32[8,256], index: 0, kind: input, shape index: {}]   ;;  %s40_s1 = inlined_call_operand.vmem [shape: f32[8,1], index: 1, kind: output, shape index: {}]  }
   0x1   :  { %v8_v0 = vld [vmem:[%s39_s0] sm:$0xff]  ;;  %v9_v1 = vld [vmem:[%s39_s0 + $0x8] sm:$0xff] }
   0x2   :  { %v10_v2 = vadd.f32 %v9_v1, %v8_v0 }
   0x4   :  { %11 = vadd.xlane.f32.xlu0 %v10_v2 }
  0x91   :  { %v12_v3 = vpop.xlane.xlu0 %11 }
  0x92   :  { %v13_v4 = vmul.f32 0.00390625, %v12_v3 }
  0x94   :  { %15 = vst.msk [vmem:[%s40_s1] sm:$0xff] %vm14_vm0, %v13_v4 }

</bundles_post_ra>
